<compile_context>
chip_gen: v5e
topology: v5e:2x2
jax: 0.10.0
libtpu: 0.0.40
codegen_flags: <defaults>
</compile_context>

<pallas_src>
import functools

import jax
import jax.numpy as jnp
from jax.experimental import pallas as pl
from jax.experimental.pallas import tpu as pltpu


def _round_up(x, m):
    return (x + m - 1) // m * m


# ----------------------------------------------------------------------------
# Pallas kernel: fused GEMM + bias + optional LeakyReLU(0.01)
# ----------------------------------------------------------------------------
def _gemm_bias_act_kernel(x_ref, w_ref, b_ref, o_ref, *, leaky):
    # x_ref: (tile_m, K)   w_ref: (K, N)   b_ref: (1, N)   o_ref: (tile_m, N)
    acc = jnp.dot(x_ref[...], w_ref[...], preferred_element_type=jnp.float32)
    acc = acc + b_ref[...].astype(jnp.float32)
    if leaky:
        acc = jnp.where(acc >= 0, acc, jnp.float32(0.01) * acc)
    o_ref[...] = acc.astype(o_ref.dtype)


def _pick_tile_m(m, kc, n, in_bytes, out_bytes, budget=40 * 1024 * 1024):
    """Largest row tile (multiple of 16) whose double-buffered working set fits."""
    tile = min(512, _round_up(m, 16))
    fixed = 2 * kc * n * in_bytes + 2 * n * 4      # weights (x2 buffers) + bias
    while tile > 16:
        need = fixed + 2 * tile * kc * in_bytes + 2 * tile * n * out_bytes
        if need <= budget:
            break
        tile = max(16, _round_up(tile // 2, 16))
    return tile


def gemm_bias_act(x, w, b, *, leaky, out_dtype):
    """out = act(x @ w + b); x:(M,K), w:(K,N), b:(1,N). Tiled & pipelined over M."""
    m, kc = x.shape
    n = w.shape[1]
    in_bytes = jnp.dtype(x.dtype).itemsize
    out_bytes = jnp.dtype(out_dtype).itemsize
    tile_m = _pick_tile_m(m, kc, n, in_bytes, out_bytes)
    mp = _round_up(m, tile_m)
    if mp != m:                                   # pad rows so the grid divides evenly
        x = jnp.pad(x, ((0, mp - m), (0, 0)))

    kernel = functools.partial(_gemm_bias_act_kernel, leaky=leaky)
    flops = 2 * mp * kc * n
    bytes_accessed = (mp * kc * in_bytes + kc * n * jnp.dtype(w.dtype).itemsize
                      + n * 4 + mp * n * out_bytes)

    out = pl.pallas_call(
        kernel,
        out_shape=jax.ShapeDtypeStruct((mp, n), out_dtype),
        grid=(mp // tile_m,),
        in_specs=[
            pl.BlockSpec((tile_m, kc), lambda i: (i, 0)),   # activation rows (tiled)
            pl.BlockSpec((kc, n), lambda i: (0, 0)),        # full weight, revisited
            pl.BlockSpec((1, n), lambda i: (0, 0)),         # bias
        ],
        out_specs=pl.BlockSpec((tile_m, n), lambda i: (i, 0)),
        compiler_params=pltpu.CompilerParams(
            dimension_semantics=("parallel",),              # megacore-shardable on v7x
            vmem_limit_bytes=64 * 1024 * 1024),
        cost_estimate=pl.CostEstimate(flops=flops, transcendentals=0,
                                      bytes_accessed=bytes_accessed),
    )(x, w, b)
    if mp != m:
        out = out[:m]
    return out


# ----------------------------------------------------------------------------
# Parameter init (deterministic, PyTorch weight layout (C_out, C_in, K))
# ----------------------------------------------------------------------------
def init_params(key, num_timesteps, conv_dim, num_classes, num_domains, repeat_num):
    keys = jax.random.split(key, 2 * repeat_num + 4)
    ki = 0
    main = []
    c_in, c_out = 3, conv_dim
    for _ in range(repeat_num):  # 'initial' + 'downsample_1..repeat_num-1'
        w = jax.random.normal(keys[ki], (c_out, c_in, 4), jnp.float32) * 0.05
        ki += 1
        b = jax.random.normal(keys[ki], (c_out,), jnp.float32) * 0.05
        ki += 1
        main.append((w, b))
        c_in, c_out = c_out, c_out * 2
    curr_dim = c_in
    ks = num_timesteps // (2 ** repeat_num)
    src = jax.random.normal(keys[ki], (1, curr_dim, 2), jnp.float32) * 0.05
    ki += 1
    cls = jax.random.normal(keys[ki], (num_classes, curr_dim, ks), jnp.float32) * 0.05
    ki += 1
    dom = jax.random.normal(keys[ki], (num_domains, curr_dim, ks), jnp.float32) * 0.05
    ki += 1
    td = jax.random.normal(keys[ki], (1, curr_dim, 2), jnp.float32) * 0.05
    return {"main": main, "src": src, "cls": cls, "dom": dom, "td": td}


# ----------------------------------------------------------------------------
# One-time weight repack into im2col GEMM layout (hoisted out of the forward)
# ----------------------------------------------------------------------------
def _head_col(w):  # (C_out, C_in, K) -> (K*C_in, C_out)
    c_out, c_in, k = w.shape
    return jnp.transpose(w, (2, 1, 0)).reshape(k * c_in, c_out)


def prepare_params(params, compute_dtype=jnp.bfloat16):
    prep = {"main": []}
    for w, b in params["main"]:
        c_out = w.shape[0]
        prep["main"].append((_head_col(w).astype(compute_dtype),
                             b.reshape(1, c_out).astype(jnp.float32)))
    # src + td fused (both k=2, C_out=1)   -> (2*C_h, 2)
    st_w = jnp.concatenate([_head_col(params["src"]), _head_col(params["td"])], axis=-1)
    # cls + dom fused (both k=ks)          -> (ks*C_h, num_classes+num_domains)
    cd_w = jnp.concatenate([_head_col(params["cls"]), _head_col(params["dom"])], axis=-1)
    prep["st_w"] = st_w.astype(compute_dtype)
    prep["cd_w"] = cd_w.astype(compute_dtype)
    prep["st_b"] = jnp.zeros((1, st_w.shape[1]), jnp.float32)
    prep["cd_b"] = jnp.zeros((1, cd_w.shape[1]), jnp.float32)
    return prep


# ----------------------------------------------------------------------------
# Forward pass (im2col glue in XLA, all conv compute in the Pallas GEMM kernel)
# ----------------------------------------------------------------------------
def _im2col_k4_s2_p1(x_nwc):
    """(B,T,C) -> (B,T//2,4C) with col[b,t,k*C+c] = x_pad[b, 2t+k, c]."""
    b, t, c = x_nwc.shape
    assert t % 2 == 0, "time length must stay even at every downsampling level"
    xp = jnp.pad(x_nwc, ((0, 0), (1, 1), (0, 0)))
    to = t // 2
    cols = [xp[:, k:k + 2 * to:2, :] for k in range(4)]
    return jnp.concatenate(cols, axis=-1)


def discriminator_forward(prep, x_ncw, num_classes):
    compute_dtype = prep["main"][0][0].dtype
    x = jnp.transpose(x_ncw, (0, 2, 1)).astype(compute_dtype)   # NCW -> NWC

    # Main stack: Conv1d(k=4,s=2,p=1) + LeakyReLU(0.01) == im2col + one GEMM.
    for w_col, b2 in prep["main"]:
        b_, t_, c_ = x.shape
        xcol = _im2col_k4_s2_p1(x)                               # (B, T/2, 4C)
        y = gemm_bias_act(xcol.reshape(b_ * (t_ // 2), 4 * c_), w_col, b2,
                          leaky=True, out_dtype=compute_dtype)
        x = y.reshape(b_, t_ // 2, w_col.shape[1])

    h = x                                                        # (B, Th, Ch)
    b_, th, ch = h.shape

    # Fused src+td head: Conv1d(k=2, s=1, valid, no bias) for both, one GEMM.
    xst = jnp.concatenate([h[:, :th - 1, :], h[:, 1:, :]], axis=-1)
    yst = gemm_bias_act(xst.reshape(b_ * (th - 1), 2 * ch), prep["st_w"],
                        prep["st_b"], leaky=False, out_dtype=jnp.float32)
    yst = yst.reshape(b_, th - 1, 2)
    out_src = jnp.transpose(yst[..., 0:1], (0, 2, 1))            # (B, 1, Th-1) NCW
    out_td = jnp.transpose(yst[..., 1:2], (0, 2, 1))             # (B, 1, Th-1) NCW

    # Fused cls+dom head: Conv1d(k=ks==Th, valid, no bias) -> one row-GEMM.
    ycd = gemm_bias_act(h.reshape(b_, th * ch), prep["cd_w"], prep["cd_b"],
                        leaky=False, out_dtype=jnp.float32)
    out_cls = ycd[:, :num_classes]
    out_dom = ycd[:, num_classes:]
    return out_src, out_cls, out_dom, out_td


# ----------------------------------------------------------------------------
# Pure-JAX reference (lax.conv, HIGHEST precision) for correctness checking
# ----------------------------------------------------------------------------
def _ref_conv1d(x, w, b, stride, padding):
    out = jax.lax.conv_general_dilated(
        x, w, window_strides=(stride,), padding=[(padding, padding)],
        dimension_numbers=("NCH", "OIH", "NCH"),
        precision=jax.lax.Precision.HIGHEST)
    if b is not None:
        out = out + b[None, :, None]
    return out


def reference_forward(params, x_ncw):
    h = x_ncw
    for w, b in params["main"]:
        h = _ref_conv1d(h, w, b, 2, 1)
        h = jnp.where(h >= 0, h, 0.01 * h)
    out_src = _ref_conv1d(h, params["src"], None, 1, 0)
    out_cls = _ref_conv1d(h, params["cls"], None, 1, 0)[:, :, 0]
    out_dom = _ref_conv1d(h, params["dom"], None, 1, 0)[:, :, 0]
    out_td = _ref_conv1d(h, params["td"], None, 1, 0)
    return out_src, out_cls, out_dom, out_td


if __name__ == "__main__":
    # Small but structurally faithful config:
    #   Discriminator(num_timesteps=64, conv_dim=8, num_classes=5,
    #                 num_domains=10, repeat_num=4), batch=2
    B = 2
    num_timesteps, conv_dim, num_classes, num_domains, repeat_num = 64, 8, 5, 10, 4
    assert num_timesteps % (2 ** repeat_num) == 0

    key = jax.random.PRNGKey(0)
    k_params, k_x = jax.random.split(key)
    params = init_params(k_params, num_timesteps, conv_dim,
                         num_classes, num_domains, repeat_num)
    x = jax.random.normal(k_x, (B, 3, num_timesteps), jnp.float32)

    fwd = jax.jit(discriminator_forward, static_argnums=2)
    refs = reference_forward(params, x)

    # f32 path: validates the im2col / fused-head algebra at tight tolerance.
    prep_f32 = prepare_params(params, jnp.float32)
    outs_f32 = jax.block_until_ready(fwd(prep_f32, x, num_classes))
    for o, r in zip(outs_f32, refs):
        assert o.shape == r.shape, (o.shape, r.shape)
        assert jnp.allclose(o, r, rtol=2e-3, atol=2e-3), float(jnp.max(jnp.abs(o - r)))

    # bf16 path (production): bf16 MXU operands, f32 accumulation + epilogue.
    # Looser tolerance accounts for the deliberate bf16 operand rounding.
    prep_bf16 = prepare_params(params, jnp.bfloat16)
    outs_bf16 = jax.block_until_ready(fwd(prep_bf16, x, num_classes))
    for o, r in zip(outs_bf16, refs):
        assert o.shape == r.shape, (o.shape, r.shape)
        assert jnp.allclose(o, r, rtol=1e-1, atol=2e-2), float(jnp.max(jnp.abs(o - r)))

    print("KERNEL_OK")
</pallas_src>

<mosaic_0001>
module attributes {stable_mosaic.version = 11 : i64} {
  func.func @_gemm_bias_act_kernel(%arg0: i32, %arg1: memref<64x12xf32, #tpu.memory_space<vmem>>, %arg2: memref<12x8xf32, #tpu.memory_space<vmem>>, %arg3: memref<1x8xf32, #tpu.memory_space<vmem>>, %arg4: memref<64x8xf32, #tpu.memory_space<vmem>>) attributes {dimension_semantics = [#tpu.dimension_semantics<parallel>], iteration_bounds = array<i64: 1>, scalar_prefetch = 0 : i64, scratch_operands = 0 : i64, tpu.core_type = #tpu.core_type<tc>, window_params = [{transform_indices = @transform_0, window_bounds = array<i64: 64, 12>}, {pipeline_mode = #tpu.pipeline_mode<synchronous>, transform_indices = @transform_1, window_bounds = array<i64: 12, 8>}, {pipeline_mode = #tpu.pipeline_mode<synchronous>, transform_indices = @transform_2, window_bounds = array<i64: 1, 8>}, {transform_indices = @transform_3, window_bounds = array<i64: 64, 8>}]} {
    %c0 = arith.constant 0 : index
    %c0_0 = arith.constant 0 : index
    %0 = vector.load %arg1[%c0, %c0_0] : memref<64x12xf32, #tpu.memory_space<vmem>>, vector<64x12xf32>
    %c0_1 = arith.constant 0 : index
    %c0_2 = arith.constant 0 : index
    %1 = vector.load %arg2[%c0_1, %c0_2] : memref<12x8xf32, #tpu.memory_space<vmem>>, vector<12x8xf32>
    %cst = arith.constant dense<0.000000e+00> : vector<64x8xf32>
    %2 = tpu.matmul %0, %1, %cst {dimension_numbers = #tpu.dot_dimension_numbers<[1], [0], [0], [1], [0, 0, 1, 1], [], []>} : vector<64x12xf32>, vector<12x8xf32>, vector<64x8xf32> -> vector<64x8xf32>
    %c0_3 = arith.constant 0 : index
    %c0_4 = arith.constant 0 : index
    %3 = vector.load %arg3[%c0_3, %c0_4] : memref<1x8xf32, #tpu.memory_space<vmem>>, vector<1x8xf32>
    %4 = vector.broadcast %3 : vector<1x8xf32> to vector<64x8xf32>
    %5 = arith.addf %2, %4 : vector<64x8xf32>
    %cst_5 = arith.constant 0.000000e+00 : f32
    %6 = vector.broadcast %cst_5 : f32 to vector<64x8xf32>
    %7 = arith.cmpf oge, %5, %6 : vector<64x8xf32>
    %cst_6 = arith.constant 0.00999999977 : f32
    %8 = vector.broadcast %cst_6 : f32 to vector<64x8xf32>
    %9 = arith.mulf %8, %5 : vector<64x8xf32>
    %10 = arith.select %7, %5, %9 : vector<64x8xi1>, vector<64x8xf32>
    %c0_7 = arith.constant 0 : index
    %c0_8 = arith.constant 0 : index
    %11 = vector.load %arg4[%c0_7, %c0_8] : memref<64x8xf32, #tpu.memory_space<vmem>>, vector<64x8xf32>
    tpu.vector_store %arg4[%c0_7, %c0_8], %10 {strides = array<i32>} : memref<64x8xf32, #tpu.memory_space<vmem>>, vector<64x8xf32>,
    return
  }
  func.func @transform_0(%arg0: i32) -> (i32, i32) {
    %c0_i32 = arith.constant 0 : i32
    %c0_i32_0 = arith.constant 0 : i32
    return %arg0, %c0_i32 : i32, i32
  }
  func.func @transform_1(%arg0: i32) -> (i32, i32) {
    %c0_i32 = arith.constant 0 : i32
    %c0_i32_0 = arith.constant 0 : i32
    %c0_i32_1 = arith.constant 0 : i32
    return %c0_i32, %c0_i32_0 : i32, i32
  }
  func.func @transform_2(%arg0: i32) -> (i32, i32) {
    %c0_i32 = arith.constant 0 : i32
    %c0_i32_0 = arith.constant 0 : i32
    %c0_i32_1 = arith.constant 0 : i32
    return %c0_i32, %c0_i32_0 : i32, i32
  }
  func.func @transform_3(%arg0: i32) -> (i32, i32) {
    %c0_i32 = arith.constant 0 : i32
    %c0_i32_0 = arith.constant 0 : i32
    return %arg0, %c0_i32 : i32, i32
  }
}

module attributes {stable_mosaic.version = 11 : i64} {
  func.func @_gemm_bias_act_kernel(%arg0: i32, %arg1: memref<32x32xf32, #tpu.memory_space<vmem>>, %arg2: memref<32x16xf32, #tpu.memory_space<vmem>>, %arg3: memref<1x16xf32, #tpu.memory_space<vmem>>, %arg4: memref<32x16xf32, #tpu.memory_space<vmem>>) attributes {dimension_semantics = [#tpu.dimension_semantics<parallel>], iteration_bounds = array<i64: 1>, scalar_prefetch = 0 : i64, scratch_operands = 0 : i64, tpu.core_type = #tpu.core_type<tc>, window_params = [{transform_indices = @transform_0, window_bounds = array<i64: 32, 32>}, {pipeline_mode = #tpu.pipeline_mode<synchronous>, transform_indices = @transform_1, window_bounds = array<i64: 32, 16>}, {pipeline_mode = #tpu.pipeline_mode<synchronous>, transform_indices = @transform_2, window_bounds = array<i64: 1, 16>}, {transform_indices = @transform_3, window_bounds = array<i64: 32, 16>}]} {
    %c0 = arith.constant 0 : index
    %c0_0 = arith.constant 0 : index
    %0 = vector.load %arg1[%c0, %c0_0] : memref<32x32xf32, #tpu.memory_space<vmem>>, vector<32x32xf32>
    %c0_1 = arith.constant 0 : index
    %c0_2 = arith.constant 0 : index
    %1 = vector.load %arg2[%c0_1, %c0_2] : memref<32x16xf32, #tpu.memory_space<vmem>>, vector<32x16xf32>
    %cst = arith.constant dense<0.000000e+00> : vector<32x16xf32>
    %2 = tpu.matmul %0, %1, %cst {dimension_numbers = #tpu.dot_dimension_numbers<[1], [0], [0], [1], [0, 0, 1, 1], [], []>} : vector<32x32xf32>, vector<32x16xf32>, vector<32x16xf32> -> vector<32x16xf32>
    %c0_3 = arith.constant 0 : index
    %c0_4 = arith.constant 0 : index
    %3 = vector.load %arg3[%c0_3, %c0_4] : memref<1x16xf32, #tpu.memory_space<vmem>>, vector<1x16xf32>
    %4 = vector.broadcast %3 : vector<1x16xf32> to vector<32x16xf32>
    %5 = arith.addf %2, %4 : vector<32x16xf32>
    %cst_5 = arith.constant 0.000000e+00 : f32
    %6 = vector.broadcast %cst_5 : f32 to vector<32x16xf32>
    %7 = arith.cmpf oge, %5, %6 : vector<32x16xf32>
    %cst_6 = arith.constant 0.00999999977 : f32
    %8 = vector.broadcast %cst_6 : f32 to vector<32x16xf32>
    %9 = arith.mulf %8, %5 : vector<32x16xf32>
    %10 = arith.select %7, %5, %9 : vector<32x16xi1>, vector<32x16xf32>
    %c0_7 = arith.constant 0 : index
    %c0_8 = arith.constant 0 : index
    %11 = vector.load %arg4[%c0_7, %c0_8] : memref<32x16xf32, #tpu.memory_space<vmem>>, vector<32x16xf32>
    tpu.vector_store %arg4[%c0_7, %c0_8], %10 {strides = array<i32>} : memref<32x16xf32, #tpu.memory_space<vmem>>, vector<32x16xf32>,
    return
  }
  func.func @transform_0(%arg0: i32) -> (i32, i32) {
    %c0_i32 = arith.constant 0 : i32
    %c0_i32_0 = arith.constant 0 : i32
    return %arg0, %c0_i32 : i32, i32
  }
  func.func @transform_1(%arg0: i32) -> (i32, i32) {
    %c0_i32 = arith.constant 0 : i32
    %c0_i32_0 = arith.constant 0 : i32
    %c0_i32_1 = arith.constant 0 : i32
    return %c0_i32, %c0_i32_0 : i32, i32
  }
  func.func @transform_2(%arg0: i32) -> (i32, i32) {
    %c0_i32 = arith.constant 0 : i32
    %c0_i32_0 = arith.constant 0 : i32
    %c0_i32_1 = arith.constant 0 : i32
    return %c0_i32, %c0_i32_0 : i32, i32
  }
  func.func @transform_3(%arg0: i32) -> (i32, i32) {
    %c0_i32 = arith.constant 0 : i32
    %c0_i32_0 = arith.constant 0 : i32
    return %arg0, %c0_i32 : i32, i32
  }
}

module attributes {stable_mosaic.version = 11 : i64} {
  func.func @_gemm_bias_act_kernel(%arg0: i32, %arg1: memref<16x64xf32, #tpu.memory_space<vmem>>, %arg2: memref<64x32xf32, #tpu.memory_space<vmem>>, %arg3: memref<1x32xf32, #tpu.memory_space<vmem>>, %arg4: memref<16x32xf32, #tpu.memory_space<vmem>>) attributes {dimension_semantics = [#tpu.dimension_semantics<parallel>], iteration_bounds = array<i64: 1>, scalar_prefetch = 0 : i64, scratch_operands = 0 : i64, tpu.core_type = #tpu.core_type<tc>, window_params = [{transform_indices = @transform_0, window_bounds = array<i64: 16, 64>}, {pipeline_mode = #tpu.pipeline_mode<synchronous>, transform_indices = @transform_1, window_bounds = array<i64: 64, 32>}, {pipeline_mode = #tpu.pipeline_mode<synchronous>, transform_indices = @transform_2, window_bounds = array<i64: 1, 32>}, {transform_indices = @transform_3, window_bounds = array<i64: 16, 32>}]} {
    %c0 = arith.constant 0 : index
    %c0_0 = arith.constant 0 : index
    %0 = vector.load %arg1[%c0, %c0_0] : memref<16x64xf32, #tpu.memory_space<vmem>>, vector<16x64xf32>
    %c0_1 = arith.constant 0 : index
    %c0_2 = arith.constant 0 : index
    %1 = vector.load %arg2[%c0_1, %c0_2] : memref<64x32xf32, #tpu.memory_space<vmem>>, vector<64x32xf32>
    %cst = arith.constant dense<0.000000e+00> : vector<16x32xf32>
    %2 = tpu.matmul %0, %1, %cst {dimension_numbers = #tpu.dot_dimension_numbers<[1], [0], [0], [1], [0, 0, 1, 1], [], []>} : vector<16x64xf32>, vector<64x32xf32>, vector<16x32xf32> -> vector<16x32xf32>
    %c0_3 = arith.constant 0 : index
    %c0_4 = arith.constant 0 : index
    %3 = vector.load %arg3[%c0_3, %c0_4] : memref<1x32xf32, #tpu.memory_space<vmem>>, vector<1x32xf32>
    %4 = vector.broadcast %3 : vector<1x32xf32> to vector<16x32xf32>
    %5 = arith.addf %2, %4 : vector<16x32xf32>
    %cst_5 = arith.constant 0.000000e+00 : f32
    %6 = vector.broadcast %cst_5 : f32 to vector<16x32xf32>
    %7 = arith.cmpf oge, %5, %6 : vector<16x32xf32>
    %cst_6 = arith.constant 0.00999999977 : f32
    %8 = vector.broadcast %cst_6 : f32 to vector<16x32xf32>
    %9 = arith.mulf %8, %5 : vector<16x32xf32>
    %10 = arith.select %7, %5, %9 : vector<16x32xi1>, vector<16x32xf32>
    %c0_7 = arith.constant 0 : index
    %c0_8 = arith.constant 0 : index
    %11 = vector.load %arg4[%c0_7, %c0_8] : memref<16x32xf32, #tpu.memory_space<vmem>>, vector<16x32xf32>
    tpu.vector_store %arg4[%c0_7, %c0_8], %10 {strides = array<i32>} : memref<16x32xf32, #tpu.memory_space<vmem>>, vector<16x32xf32>,
    return
  }
  func.func @transform_0(%arg0: i32) -> (i32, i32) {
    %c0_i32 = arith.constant 0 : i32
    %c0_i32_0 = arith.constant 0 : i32
    return %arg0, %c0_i32 : i32, i32
  }
  func.func @transform_1(%arg0: i32) -> (i32, i32) {
    %c0_i32 = arith.constant 0 : i32
    %c0_i32_0 = arith.constant 0 : i32
    %c0_i32_1 = arith.constant 0 : i32
    return %c0_i32, %c0_i32_0 : i32, i32
  }
  func.func @transform_2(%arg0: i32) -> (i32, i32) {
    %c0_i32 = arith.constant 0 : i32
    %c0_i32_0 = arith.constant 0 : i32
    %c0_i32_1 = arith.constant 0 : i32
    return %c0_i32, %c0_i32_0 : i32, i32
  }
  func.func @transform_3(%arg0: i32) -> (i32, i32) {
    %c0_i32 = arith.constant 0 : i32
    %c0_i32_0 = arith.constant 0 : i32
    return %arg0, %c0_i32 : i32, i32
  }
}

module attributes {stable_mosaic.version = 11 : i64} {
  func.func @_gemm_bias_act_kernel(%arg0: i32, %arg1: memref<16x128xf32, #tpu.memory_space<vmem>>, %arg2: memref<128x64xf32, #tpu.memory_space<vmem>>, %arg3: memref<1x64xf32, #tpu.memory_space<vmem>>, %arg4: memref<16x64xf32, #tpu.memory_space<vmem>>) attributes {dimension_semantics = [#tpu.dimension_semantics<parallel>], iteration_bounds = array<i64: 1>, scalar_prefetch = 0 : i64, scratch_operands = 0 : i64, tpu.core_type = #tpu.core_type<tc>, window_params = [{transform_indices = @transform_0, window_bounds = array<i64: 16, 128>}, {pipeline_mode = #tpu.pipeline_mode<synchronous>, transform_indices = @transform_1, window_bounds = array<i64: 128, 64>}, {pipeline_mode = #tpu.pipeline_mode<synchronous>, transform_indices = @transform_2, window_bounds = array<i64: 1, 64>}, {transform_indices = @transform_3, window_bounds = array<i64: 16, 64>}]} {
    %c0 = arith.constant 0 : index
    %c0_0 = arith.constant 0 : index
    %0 = vector.load %arg1[%c0, %c0_0] : memref<16x128xf32, #tpu.memory_space<vmem>>, vector<16x128xf32>
    %c0_1 = arith.constant 0 : index
    %c0_2 = arith.constant 0 : index
    %1 = vector.load %arg2[%c0_1, %c0_2] : memref<128x64xf32, #tpu.memory_space<vmem>>, vector<128x64xf32>
    %cst = arith.constant dense<0.000000e+00> : vector<16x64xf32>
    %2 = tpu.matmul %0, %1, %cst {dimension_numbers = #tpu.dot_dimension_numbers<[1], [0], [0], [1], [0, 0, 1, 1], [], []>} : vector<16x128xf32>, vector<128x64xf32>, vector<16x64xf32> -> vector<16x64xf32>
    %c0_3 = arith.constant 0 : index
    %c0_4 = arith.constant 0 : index
    %3 = vector.load %arg3[%c0_3, %c0_4] : memref<1x64xf32, #tpu.memory_space<vmem>>, vector<1x64xf32>
    %4 = vector.broadcast %3 : vector<1x64xf32> to vector<16x64xf32>
    %5 = arith.addf %2, %4 : vector<16x64xf32>
    %cst_5 = arith.constant 0.000000e+00 : f32
    %6 = vector.broadcast %cst_5 : f32 to vector<16x64xf32>
    %7 = arith.cmpf oge, %5, %6 : vector<16x64xf32>
    %cst_6 = arith.constant 0.00999999977 : f32
    %8 = vector.broadcast %cst_6 : f32 to vector<16x64xf32>
    %9 = arith.mulf %8, %5 : vector<16x64xf32>
    %10 = arith.select %7, %5, %9 : vector<16x64xi1>, vector<16x64xf32>
    %c0_7 = arith.constant 0 : index
    %c0_8 = arith.constant 0 : index
    %11 = vector.load %arg4[%c0_7, %c0_8] : memref<16x64xf32, #tpu.memory_space<vmem>>, vector<16x64xf32>
    tpu.vector_store %arg4[%c0_7, %c0_8], %10 {strides = array<i32>} : memref<16x64xf32, #tpu.memory_space<vmem>>, vector<16x64xf32>,
    return
  }
  func.func @transform_0(%arg0: i32) -> (i32, i32) {
    %c0_i32 = arith.constant 0 : i32
    %c0_i32_0 = arith.constant 0 : i32
    return %arg0, %c0_i32 : i32, i32
  }
  func.func @transform_1(%arg0: i32) -> (i32, i32) {
    %c0_i32 = arith.constant 0 : i32
    %c0_i32_0 = arith.constant 0 : i32
    %c0_i32_1 = arith.constant 0 : i32
    return %c0_i32, %c0_i32_0 : i32, i32
  }
  func.func @transform_2(%arg0: i32) -> (i32, i32) {
    %c0_i32 = arith.constant 0 : i32
    %c0_i32_0 = arith.constant 0 : i32
    %c0_i32_1 = arith.constant 0 : i32
    return %c0_i32, %c0_i32_0 : i32, i32
  }
  func.func @transform_3(%arg0: i32) -> (i32, i32) {
    %c0_i32 = arith.constant 0 : i32
    %c0_i32_0 = arith.constant 0 : i32
    return %arg0, %c0_i32 : i32, i32
  }
}

module attributes {stable_mosaic.version = 11 : i64} {
  func.func @_gemm_bias_act_kernel(%arg0: i32, %arg1: memref<16x128xf32, #tpu.memory_space<vmem>>, %arg2: memref<128x2xf32, #tpu.memory_space<vmem>>, %arg3: memref<1x2xf32, #tpu.memory_space<vmem>>, %arg4: memref<16x2xf32, #tpu.memory_space<vmem>>) attributes {dimension_semantics = [#tpu.dimension_semantics<parallel>], iteration_bounds = array<i64: 1>, scalar_prefetch = 0 : i64, scratch_operands = 0 : i64, tpu.core_type = #tpu.core_type<tc>, window_params = [{transform_indices = @transform_0, window_bounds = array<i64: 16, 128>}, {pipeline_mode = #tpu.pipeline_mode<synchronous>, transform_indices = @transform_1, window_bounds = array<i64: 128, 2>}, {pipeline_mode = #tpu.pipeline_mode<synchronous>, transform_indices = @transform_2, window_bounds = array<i64: 1, 2>}, {transform_indices = @transform_3, window_bounds = array<i64: 16, 2>}]} {
    %c0 = arith.constant 0 : index
    %c0_0 = arith.constant 0 : index
    %0 = vector.load %arg1[%c0, %c0_0] : memref<16x128xf32, #tpu.memory_space<vmem>>, vector<16x128xf32>
    %c0_1 = arith.constant 0 : index
    %c0_2 = arith.constant 0 : index
    %1 = vector.load %arg2[%c0_1, %c0_2] : memref<128x2xf32, #tpu.memory_space<vmem>>, vector<128x2xf32>
    %cst = arith.constant dense<0.000000e+00> : vector<16x2xf32>
    %2 = tpu.matmul %0, %1, %cst {dimension_numbers = #tpu.dot_dimension_numbers<[1], [0], [0], [1], [0, 0, 1, 1], [], []>} : vector<16x128xf32>, vector<128x2xf32>, vector<16x2xf32> -> vector<16x2xf32>
    %c0_3 = arith.constant 0 : index
    %c0_4 = arith.constant 0 : index
    %3 = vector.load %arg3[%c0_3, %c0_4] : memref<1x2xf32, #tpu.memory_space<vmem>>, vector<1x2xf32>
    %4 = vector.broadcast %3 : vector<1x2xf32> to vector<16x2xf32>
    %5 = arith.addf %2, %4 : vector<16x2xf32>
    %c0_5 = arith.constant 0 : index
    %c0_6 = arith.constant 0 : index
    %6 = vector.load %arg4[%c0_5, %c0_6] : memref<16x2xf32, #tpu.memory_space<vmem>>, vector<16x2xf32>
    tpu.vector_store %arg4[%c0_5, %c0_6], %5 {strides = array<i32>} : memref<16x2xf32, #tpu.memory_space<vmem>>, vector<16x2xf32>,
    return
  }
  func.func @transform_0(%arg0: i32) -> (i32, i32) {
    %c0_i32 = arith.constant 0 : i32
    %c0_i32_0 = arith.constant 0 : i32
    return %arg0, %c0_i32 : i32, i32
  }
  func.func @transform_1(%arg0: i32) -> (i32, i32) {
    %c0_i32 = arith.constant 0 : i32
    %c0_i32_0 = arith.constant 0 : i32
    %c0_i32_1 = arith.constant 0 : i32
    return %c0_i32, %c0_i32_0 : i32, i32
  }
  func.func @transform_2(%arg0: i32) -> (i32, i32) {
    %c0_i32 = arith.constant 0 : i32
    %c0_i32_0 = arith.constant 0 : i32
    %c0_i32_1 = arith.constant 0 : i32
    return %c0_i32, %c0_i32_0 : i32, i32
  }
  func.func @transform_3(%arg0: i32) -> (i32, i32) {
    %c0_i32 = arith.constant 0 : i32
    %c0_i32_0 = arith.constant 0 : i32
    return %arg0, %c0_i32 : i32, i32
  }
}

module attributes {stable_mosaic.version = 11 : i64} {
  func.func @_gemm_bias_act_kernel(%arg0: i32, %arg1: memref<16x256xf32, #tpu.memory_space<vmem>>, %arg2: memref<256x15xf32, #tpu.memory_space<vmem>>, %arg3: memref<1x15xf32, #tpu.memory_space<vmem>>, %arg4: memref<16x15xf32, #tpu.memory_space<vmem>>) attributes {dimension_semantics = [#tpu.dimension_semantics<parallel>], iteration_bounds = array<i64: 1>, scalar_prefetch = 0 : i64, scratch_operands = 0 : i64, tpu.core_type = #tpu.core_type<tc>, window_params = [{transform_indices = @transform_0, window_bounds = array<i64: 16, 256>}, {pipeline_mode = #tpu.pipeline_mode<synchronous>, transform_indices = @transform_1, window_bounds = array<i64: 256, 15>}, {pipeline_mode = #tpu.pipeline_mode<synchronous>, transform_indices = @transform_2, window_bounds = array<i64: 1, 15>}, {transform_indices = @transform_3, window_bounds = array<i64: 16, 15>}]} {
    %c0 = arith.constant 0 : index
    %c0_0 = arith.constant 0 : index
    %0 = vector.load %arg1[%c0, %c0_0] : memref<16x256xf32, #tpu.memory_space<vmem>>, vector<16x256xf32>
    %c0_1 = arith.constant 0 : index
    %c0_2 = arith.constant 0 : index
    %1 = vector.load %arg2[%c0_1, %c0_2] : memref<256x15xf32, #tpu.memory_space<vmem>>, vector<256x15xf32>
    %cst = arith.constant dense<0.000000e+00> : vector<16x15xf32>
    %2 = tpu.matmul %0, %1, %cst {dimension_numbers = #tpu.dot_dimension_numbers<[1], [0], [0], [1], [0, 0, 1, 1], [], []>} : vector<16x256xf32>, vector<256x15xf32>, vector<16x15xf32> -> vector<16x15xf32>
    %c0_3 = arith.constant 0 : index
    %c0_4 = arith.constant 0 : index
    %3 = vector.load %arg3[%c0_3, %c0_4] : memref<1x15xf32, #tpu.memory_space<vmem>>, vector<1x15xf32>
    %4 = vector.broadcast %3 : vector<1x15xf32> to vector<16x15xf32>
    %5 = arith.addf %2, %4 : vector<16x15xf32>
    %c0_5 = arith.constant 0 : index
    %c0_6 = arith.constant 0 : index
    %6 = vector.load %arg4[%c0_5, %c0_6] : memref<16x15xf32, #tpu.memory_space<vmem>>, vector<16x15xf32>
    tpu.vector_store %arg4[%c0_5, %c0_6], %5 {strides = array<i32>} : memref<16x15xf32, #tpu.memory_space<vmem>>, vector<16x15xf32>,
    return
  }
  func.func @transform_0(%arg0: i32) -> (i32, i32) {
    %c0_i32 = arith.constant 0 : i32
    %c0_i32_0 = arith.constant 0 : i32
    return %arg0, %c0_i32 : i32, i32
  }
  func.func @transform_1(%arg0: i32) -> (i32, i32) {
    %c0_i32 = arith.constant 0 : i32
    %c0_i32_0 = arith.constant 0 : i32
    %c0_i32_1 = arith.constant 0 : i32
    return %c0_i32, %c0_i32_0 : i32, i32
  }
  func.func @transform_2(%arg0: i32) -> (i32, i32) {
    %c0_i32 = arith.constant 0 : i32
    %c0_i32_0 = arith.constant 0 : i32
    %c0_i32_1 = arith.constant 0 : i32
    return %c0_i32, %c0_i32_0 : i32, i32
  }
  func.func @transform_3(%arg0: i32) -> (i32, i32) {
    %c0_i32 = arith.constant 0 : i32
    %c0_i32_0 = arith.constant 0 : i32
    return %arg0, %c0_i32 : i32, i32
  }
}

</mosaic_0001>

<bundles_post_ra>
// kernel: discriminator_forward.6
= control target key start
LH: loop header
LB: loop body
LE: loop exit
PB: predicated region body
PF: predicated region fallthrough
CT: control target
= control target key end

     0   :  { %vm53_vm0 = vcmask 1043456   ;;  %vm28_vm1 = vcmask 97280   ;;  %vm122_vm2 = vcmask 64512   ;;  %s244_s1 = inlined_call_operand.vmem [shape: f32[12,8], index: 1, kind: input, shape index: {}]   ;;  %s245_s0 = inlined_call_operand.vmem [shape: f32[64,12], index: 0, kind: input, shape index: {}]   ;;  %s246_s2 = inlined_call_operand.vmem [shape: f32[1,8], index: 2, kind: input, shape index: {}]   ;;  %s247_s3 = inlined_call_operand.vmem [shape: f32[64,8], index: 3, kind: output, shape index: {}]  }
   0x1   :  { %v23_v0 = vld [vmem:[%s244_s1 + $0x8] sm:$0xf]  ;;  %v22_v1 = vld [vmem:[%s244_s1] sm:$0xff]  ;;  %v20_v3 = vld [vmem:[%s245_s0 + $0x30] sm:$0xff] }
   0x2   :  { %145 = vmatpush.msk.msra.mxu2 %vm53_vm0, %v23_v0  ;;  %146 = vmatpush.msk.msra.mxu3 %vm53_vm0, %v23_v0  ;;  %v18_v2 = vld [vmem:[%s245_s0 + $0x20] sm:$0xff]  ;;  %v16_v5 = vld [vmem:[%s245_s0 + $0x10] sm:$0xff]  ;;  %v19_v6 = vld [vmem:[%s245_s0 + $0x28] sm:$0xff] }
   0x3   :  { %135 = vmatpush.msk.msra.mxu0 %vm53_vm0, %v23_v0  ;;  %144 = vmatpush.msk.msra.mxu1 %vm53_vm0, %v23_v0  ;;  %v14_v4 = vld [vmem:[%s245_s0] sm:$0xff]  ;;  %v21_v7 = vld [vmem:[%s245_s0 + $0x38] sm:$0xff]  ;;  %v15_v8 = vld [vmem:[%s245_s0 + $0x8] sm:$0xff] }
   0x4   :  { %148 = vmatpush.msra.mxu2 %v22_v1  ;;  %149 = vmatpush.msra.mxu3 %v22_v1  ;;  %v17_v9 = vld [vmem:[%s245_s0 + $0x18] sm:$0xff]  ;;  %v150_v10 = vld [vmem:[%s246_s2] ss:$0 sm:$0xff] }
   0x5   :  { %140 = vmatmul.msk.f32.vlgmr.msra.gmra.mxu2 %vm28_vm1, %v18_v2  ;;  %142 = vmatmul.msk.f32.vlgmr.msra.gmra.mxu3 %vm28_vm1, %v20_v3 }
   0x6   :  { %72 = vmatpush.msra.mxu0 %v22_v1  ;;  %147 = vmatpush.msra.mxu1 %v22_v1 }
   0x7   :  { %136 = vmatmul.msk.f32.vlgmr.msra.gmra.mxu0 %vm28_vm1, %v14_v4  ;;  %138 = vmatmul.msk.f32.vlgmr.msra.gmra.mxu1 %vm28_vm1, %v16_v5 }
   0xd   :  { %141 = vmatmul.msk.f32.gmra.mxu2 %vm28_vm1, %v19_v6  ;;  %143 = vmatmul.msk.f32.gmra.mxu3 %vm28_vm1, %v21_v7 }
   0xf   :  { %137 = vmatmul.msk.f32.gmra.mxu0 %vm28_vm1, %v15_v8  ;;  %139 = vmatmul.msk.f32.gmra.mxu1 %vm28_vm1, %v17_v9 }
  0x84   :  { %v74_v11 = vpop.f32.mrf.mxu0  ;;  %v80_v12 = vpop.f32.mrf.mxu1 }
  0x85   :  { %v75_v13 = vadd.f32 %v150_v10, %v74_v11  ;;  %v81_v14 = vadd.f32 %v150_v10, %v80_v12 }
  0x87   :  { %vm98_vm3 = vcmp.ge.f32.partialorder %v75_v13, 0.0  ;;  %v106_v15 = vmul.f32 0.01, %v75_v13  ;;  %vm100_vm4 = vcmp.ge.f32.partialorder %v81_v14, 0.0  ;;  %v108_v16 = vmul.f32 0.01, %v81_v14 }
  0x88   :  { %v86_v17 = vpop.f32.mrf.mxu2  ;;  %v92_v18 = vpop.f32.mrf.mxu3 }
  0x89   :  { %v114_v19 = vsel %vm98_vm3, %v75_v13, %v106_v15  ;;  %v116_v20 = vsel %vm100_vm4, %v81_v14, %v108_v16  ;;  %v87_v21 = vadd.f32 %v150_v10, %v86_v17  ;;  %v93_v22 = vadd.f32 %v150_v10, %v92_v18 }
  0x8a   :  { %123 = vst.msk [vmem:[%s247_s3] sm:$0xff] %vm122_vm2, %v114_v19 }
  0x8b   :  { %125 = vst.msk [vmem:[%s247_s3 + $0x10] sm:$0xff] %vm122_vm2, %v116_v20  ;;  %vm102_vm5 = vcmp.ge.f32.partialorder %v87_v21, 0.0  ;;  %v110_v23 = vmul.f32 0.01, %v87_v21  ;;  %vm104_vm6 = vcmp.ge.f32.partialorder %v93_v22, 0.0 }
  0x8c   :  { %v112_v24 = vmul.f32 0.01, %v93_v22  ;;  %v77_v25 = vpop.f32.mrf.mxu0  ;;  %v83_v26 = vpop.f32.mrf.mxu1 }
  0x8d   :  { %v118_v27 = vsel %vm102_vm5, %v87_v21, %v110_v23  ;;  %v78_v28 = vadd.f32 %v150_v10, %v77_v25  ;;  %v84_v29 = vadd.f32 %v150_v10, %v83_v26 }
  0x8e   :  { %127 = vst.msk [vmem:[%s247_s3 + $0x20] sm:$0xff] %vm122_vm2, %v118_v27  ;;  %v120_v30 = vsel %vm104_vm6, %v93_v22, %v112_v24 }
  0x8f   :  { %129 = vst.msk [vmem:[%s247_s3 + $0x30] sm:$0xff] %vm122_vm2, %v120_v30  ;;  %vm99_vm7 = vcmp.ge.f32.partialorder %v78_v28, 0.0  ;;  %v107_v31 = vmul.f32 0.01, %v78_v28  ;;  %vm101_vm8 = vcmp.ge.f32.partialorder %v84_v29, 0.0 }
  0x90   :  { %v109_v32 = vmul.f32 0.01, %v84_v29  ;;  %v89_v33 = vpop.f32.mrf.mxu2  ;;  %v95_v34 = vpop.f32.mrf.mxu3 }
  0x91   :  { %v115_v35 = vsel %vm99_vm7, %v78_v28, %v107_v31  ;;  %v90_v36 = vadd.f32 %v150_v10, %v89_v33  ;;  %v96_v37 = vadd.f32 %v150_v10, %v95_v34 }
  0x92   :  { %124 = vst.msk [vmem:[%s247_s3 + $0x8] sm:$0xff] %vm122_vm2, %v115_v35  ;;  %v117_v38 = vsel %vm101_vm8, %v84_v29, %v109_v32 }
  0x93   :  { %126 = vst.msk [vmem:[%s247_s3 + $0x18] sm:$0xff] %vm122_vm2, %v117_v38  ;;  %vm103_vm9 = vcmp.ge.f32.partialorder %v90_v36, 0.0  ;;  %v111_v39 = vmul.f32 0.01, %v90_v36  ;;  %vm105_vm10 = vcmp.ge.f32.partialorder %v96_v37, 0.0 }
  0x94   :  { %v113_v40 = vmul.f32 0.01, %v96_v37 }
  0x95   :  { %v119_v41 = vsel %vm103_vm9, %v90_v36, %v111_v39 }
  0x96   :  { %128 = vst.msk [vmem:[%s247_s3 + $0x28] sm:$0xff] %vm122_vm2, %v119_v41  ;;  %v121_v42 = vsel %vm105_vm10, %v96_v37, %v113_v40 }
  0x97   :  { %130 = vst.msk [vmem:[%s247_s3 + $0x38] sm:$0xff] %vm122_vm2, %v121_v42 }

// kernel: discriminator_forward.7
= control target key start
LH: loop header
LB: loop body
LE: loop exit
PB: predicated region body
PF: predicated region fallthrough
CT: control target
= control target key end

     0   :  { %vm26_vm0 = vcmask 261120   ;;  %vm80_vm1 = vcmask 130048   ;;  %s169_s1 = inlined_call_operand.vmem [shape: f32[32,16], index: 1, kind: input, shape index: {}]   ;;  %s170_s2 = inlined_call_operand.vmem [shape: f32[1,16], index: 2, kind: input, shape index: {}]   ;;  %s171_s0 = inlined_call_operand.vmem [shape: f32[32,32], index: 0, kind: input, shape index: {}]   ;;  %s172_s3 = inlined_call_operand.vmem [shape: f32[32,16], index: 3, kind: output, shape index: {}]  }
   0x1   :  { %v21_v0 = vld [vmem:[%s169_s1 + $0x18] sm:$0xff]  ;;  %v20_v1 = vld [vmem:[%s169_s1 + $0x10] sm:$0xff]  ;;  %v19_v2 = vld [vmem:[%s169_s1 + $0x8] sm:$0xff] }
   0x2   :  { %94 = vmatpush.msra.mxu2 %v21_v0  ;;  %95 = vmatpush.msra.mxu3 %v21_v0  ;;  %v18_v3 = vld [vmem:[%s169_s1] sm:$0xff]  ;;  %v16_v4 = vld [vmem:[%s171_s0 + $0x10] sm:$0xff]  ;;  %v17_v5 = vld [vmem:[%s171_s0 + $0x18] sm:$0xff] }
   0x3   :  { %51 = vmatpush.msra.mxu0 %v21_v0  ;;  %93 = vmatpush.msra.mxu1 %v21_v0  ;;  %v14_v6 = vld [vmem:[%s171_s0] sm:$0xff]  ;;  %v15_v7 = vld [vmem:[%s171_s0 + $0x8] sm:$0xff] }
   0x4   :  { %97 = vmatpush.msra.mxu2 %v20_v1  ;;  %98 = vmatpush.msra.mxu3 %v20_v1  ;;  %v105_v8 = vld [vmem:[%s170_s2] ss:$0 sm:$0xff] }
   0x5   :  { %52 = vmatpush.msra.mxu0 %v20_v1  ;;  %96 = vmatpush.msra.mxu1 %v20_v1 }
   0x6   :  { %100 = vmatpush.msra.mxu2 %v19_v2  ;;  %101 = vmatpush.msra.mxu3 %v19_v2 }
   0x7   :  { %53 = vmatpush.msra.mxu0 %v19_v2  ;;  %99 = vmatpush.msra.mxu1 %v19_v2 }
   0x8   :  { %103 = vmatpush.msra.mxu2 %v18_v3  ;;  %104 = vmatpush.msra.mxu3 %v18_v3 }
   0x9   :  { %91 = vmatmul.msk.f32.vlgmr.msra.gmra.mxu2 %vm26_vm0, %v16_v4  ;;  %92 = vmatmul.msk.f32.vlgmr.msra.gmra.mxu3 %vm26_vm0, %v17_v5 }
   0xa   :  { %54 = vmatpush.msra.mxu0 %v18_v3  ;;  %102 = vmatpush.msra.mxu1 %v18_v3 }
   0xb   :  { %89 = vmatmul.msk.f32.vlgmr.msra.gmra.mxu0 %vm26_vm0, %v14_v6  ;;  %90 = vmatmul.msk.f32.vlgmr.msra.gmra.mxu1 %vm26_vm0, %v15_v7 }
  0x88   :  { %v56_v9 = vpop.f32.mrf.mxu0  ;;  %v59_v10 = vpop.f32.mrf.mxu1 }
  0x89   :  { %v57_v11 = vadd.f32 %v105_v8, %v56_v9  ;;  %v60_v12 = vadd.f32 %v105_v8, %v59_v10 }
  0x8b   :  { %vm68_vm2 = vcmp.ge.f32.partialorder %v57_v11, 0.0  ;;  %v72_v13 = vmul.f32 0.01, %v57_v11  ;;  %vm69_vm3 = vcmp.ge.f32.partialorder %v60_v12, 0.0  ;;  %v73_v14 = vmul.f32 0.01, %v60_v12 }
  0x8c   :  { %v62_v15 = vpop.f32.mrf.mxu2  ;;  %v65_v16 = vpop.f32.mrf.mxu3 }
  0x8d   :  { %v76_v17 = vsel %vm68_vm2, %v57_v11, %v72_v13  ;;  %v77_v18 = vsel %vm69_vm3, %v60_v12, %v73_v14  ;;  %v63_v19 = vadd.f32 %v105_v8, %v62_v15  ;;  %v66_v20 = vadd.f32 %v105_v8, %v65_v16 }
  0x8e   :  { %81 = vst.msk [vmem:[%s172_s3] sm:$0xff] %vm80_vm1, %v76_v17 }
  0x8f   :  { %82 = vst.msk [vmem:[%s172_s3 + $0x8] sm:$0xff] %vm80_vm1, %v77_v18  ;;  %vm70_vm4 = vcmp.ge.f32.partialorder %v63_v19, 0.0  ;;  %v74_v21 = vmul.f32 0.01, %v63_v19  ;;  %vm71_vm5 = vcmp.ge.f32.partialorder %v66_v20, 0.0 }
  0x90   :  { %v75_v22 = vmul.f32 0.01, %v66_v20 }
  0x91   :  { %v78_v23 = vsel %vm70_vm4, %v63_v19, %v74_v21 }
  0x92   :  { %83 = vst.msk [vmem:[%s172_s3 + $0x10] sm:$0xff] %vm80_vm1, %v78_v23  ;;  %v79_v24 = vsel %vm71_vm5, %v66_v20, %v75_v22 }
  0x93   :  { %84 = vst.msk [vmem:[%s172_s3 + $0x18] sm:$0xff] %vm80_vm1, %v79_v24 }

// kernel: discriminator_forward.8
= control target key start
LH: loop header
LB: loop body
LE: loop exit
PB: predicated region body
PF: predicated region fallthrough
CT: control target
= control target key end

     0   :  { %vm28_vm0 = vcmask 523264   ;;  %vm64_vm1 = vcmask 261120   ;;  %s141_s1 = inlined_call_operand.vmem [shape: f32[64,32], index: 1, kind: input, shape index: {}]   ;;  %s142_s2 = inlined_call_operand.vmem [shape: f32[1,32], index: 2, kind: input, shape index: {}]   ;;  %s143_s0 = inlined_call_operand.vmem [shape: f32[16,64], index: 0, kind: input, shape index: {}]   ;;  %s144_s3 = inlined_call_operand.vmem [shape: f32[16,32], index: 3, kind: output, shape index: {}]  }
   0x1   :  { %v23_v0 = vld [vmem:[%s141_s1 + $0x38] sm:$0xff]  ;;  %v22_v1 = vld [vmem:[%s141_s1 + $0x30] sm:$0xff]  ;;  %v21_v2 = vld [vmem:[%s141_s1 + $0x28] sm:$0xff] }
   0x2   :  { %43 = vmatpush.msra.mxu0 %v23_v0  ;;  %73 = vmatpush.msra.mxu1 %v23_v0  ;;  %v20_v3 = vld [vmem:[%s141_s1 + $0x20] sm:$0xff]  ;;  %v19_v4 = vld [vmem:[%s141_s1 + $0x18] sm:$0xff]  ;;  %v18_v5 = vld [vmem:[%s141_s1 + $0x10] sm:$0xff] }
   0x3   :  { %v17_v6 = vld [vmem:[%s141_s1 + $0x8] sm:$0xff]  ;;  %v16_v7 = vld [vmem:[%s141_s1] sm:$0xff] }
   0x4   :  { %44 = vmatpush.msra.mxu0 %v22_v1  ;;  %74 = vmatpush.msra.mxu1 %v22_v1  ;;  %v14_v8 = vld [vmem:[%s143_s0] sm:$0xff]  ;;  %v15_v9 = vld [vmem:[%s143_s0 + $0x8] sm:$0xff] }
   0x5   :  { %v81_v10 = vld [vmem:[%s142_s2] ss:$0 sm:$0xff] }
   0x6   :  { %45 = vmatpush.msra.mxu0 %v21_v2  ;;  %75 = vmatpush.msra.mxu1 %v21_v2 }
   0x8   :  { %46 = vmatpush.msra.mxu0 %v20_v3  ;;  %76 = vmatpush.msra.mxu1 %v20_v3 }
   0xa   :  { %47 = vmatpush.msra.mxu0 %v19_v4  ;;  %77 = vmatpush.msra.mxu1 %v19_v4 }
   0xc   :  { %48 = vmatpush.msra.mxu0 %v18_v5  ;;  %78 = vmatpush.msra.mxu1 %v18_v5 }
   0xe   :  { %49 = vmatpush.msra.mxu0 %v17_v6  ;;  %79 = vmatpush.msra.mxu1 %v17_v6 }
  0x10   :  { %50 = vmatpush.msra.mxu0 %v16_v7  ;;  %80 = vmatpush.msra.mxu1 %v16_v7 }
  0x11   :  { %71 = vmatmul.msk.f32.vlgmr.msra.gmra.mxu0 %vm28_vm0, %v14_v8  ;;  %72 = vmatmul.msk.f32.vlgmr.msra.gmra.mxu1 %vm28_vm0, %v15_v9 }
  0x8e   :  { %v52_v11 = vpop.f32.mrf.mxu0  ;;  %v55_v12 = vpop.f32.mrf.mxu1 }
  0x8f   :  { %v53_v13 = vadd.f32 %v81_v10, %v52_v11  ;;  %v56_v14 = vadd.f32 %v81_v10, %v55_v12 }
  0x91   :  { %vm58_vm2 = vcmp.ge.f32.partialorder %v53_v13, 0.0  ;;  %v60_v15 = vmul.f32 0.01, %v53_v13  ;;  %vm59_vm3 = vcmp.ge.f32.partialorder %v56_v14, 0.0  ;;  %v61_v16 = vmul.f32 0.01, %v56_v14 }
  0x93   :  { %v62_v17 = vsel %vm58_vm2, %v53_v13, %v60_v15  ;;  %v63_v18 = vsel %vm59_vm3, %v56_v14, %v61_v16 }
  0x94   :  { %65 = vst.msk [vmem:[%s144_s3] sm:$0xff] %vm64_vm1, %v62_v17 }
  0x95   :  { %66 = vst.msk [vmem:[%s144_s3 + $0x8] sm:$0xff] %vm64_vm1, %v63_v18 }

// kernel: discriminator_forward.9
= control target key start
LH: loop header
LB: loop body
LE: loop exit
PB: predicated region body
PF: predicated region fallthrough
CT: control target
= control target key end

     0   :  { %vm65_vm0 = vcmask 523264   ;;  %s172_s1 = inlined_call_operand.vmem [shape: f32[128,64], index: 1, kind: input, shape index: {}]   ;;  %s173_s2 = inlined_call_operand.vmem [shape: f32[1,64], index: 2, kind: input, shape index: {}]   ;;  %s174_s0 = inlined_call_operand.vmem [shape: f32[16,128], index: 0, kind: input, shape index: {}]   ;;  %s175_s3 = inlined_call_operand.vmem [shape: f32[16,64], index: 3, kind: output, shape index: {}]  }
   0x1   :  { %v31_v0 = vld [vmem:[%s172_s1 + $0x78] sm:$0xff]  ;;  %v30_v1 = vld [vmem:[%s172_s1 + $0x70] sm:$0xff]  ;;  %v29_v2 = vld [vmem:[%s172_s1 + $0x68] sm:$0xff] }
   0x2   :  { %36 = vmatpush.msra.mxu0 %v31_v0  ;;  %72 = vmatpush.msra.mxu1 %v31_v0  ;;  %v28_v3 = vld [vmem:[%s172_s1 + $0x60] sm:$0xff]  ;;  %v27_v4 = vld [vmem:[%s172_s1 + $0x58] sm:$0xff]  ;;  %v26_v5 = vld [vmem:[%s172_s1 + $0x50] sm:$0xff] }
   0x3   :  { %v25_v6 = vld [vmem:[%s172_s1 + $0x48] sm:$0xff]  ;;  %v24_v7 = vld [vmem:[%s172_s1 + $0x40] sm:$0xff]  ;;  %v23_v8 = vld [vmem:[%s172_s1 + $0x38] sm:$0xff] }
   0x4   :  { %37 = vmatpush.msra.mxu0 %v30_v1  ;;  %73 = vmatpush.msra.mxu1 %v30_v1  ;;  %v22_v9 = vld [vmem:[%s172_s1 + $0x30] sm:$0xff]  ;;  %v21_v10 = vld [vmem:[%s172_s1 + $0x28] sm:$0xff]  ;;  %v20_v11 = vld [vmem:[%s172_s1 + $0x20] sm:$0xff] }
   0x5   :  { %v19_v12 = vld [vmem:[%s172_s1 + $0x18] sm:$0xff]  ;;  %v18_v13 = vld [vmem:[%s172_s1 + $0x10] sm:$0xff]  ;;  %v17_v14 = vld [vmem:[%s172_s1 + $0x8] sm:$0xff] }
   0x6   :  { %38 = vmatpush.msra.mxu0 %v29_v2  ;;  %74 = vmatpush.msra.mxu1 %v29_v2  ;;  %v16_v15 = vld [vmem:[%s172_s1] sm:$0xff]  ;;  %v15_v17 = vld [vmem:[%s174_s0 + $0x8] sm:$0xff] }
   0x7   :  { %v14_v16 = vld [vmem:[%s174_s0] sm:$0xff] }
   0x8   :  { %39 = vmatpush.msra.mxu0 %v28_v3  ;;  %75 = vmatpush.msra.mxu1 %v28_v3  ;;  %v88_v18 = vld [vmem:[%s173_s2] ss:$0 sm:$0xff] }
   0xa   :  { %40 = vmatpush.msra.mxu0 %v27_v4  ;;  %76 = vmatpush.msra.mxu1 %v27_v4 }
   0xc   :  { %41 = vmatpush.msra.mxu0 %v26_v5  ;;  %77 = vmatpush.msra.mxu1 %v26_v5 }
   0xe   :  { %42 = vmatpush.msra.mxu0 %v25_v6  ;;  %78 = vmatpush.msra.mxu1 %v25_v6 }
  0x10   :  { %43 = vmatpush.msra.mxu0 %v24_v7  ;;  %79 = vmatpush.msra.mxu1 %v24_v7 }
  0x12   :  { %44 = vmatpush.msra.mxu0 %v23_v8  ;;  %80 = vmatpush.msra.mxu1 %v23_v8 }
  0x14   :  { %45 = vmatpush.msra.mxu0 %v22_v9  ;;  %81 = vmatpush.msra.mxu1 %v22_v9 }
  0x16   :  { %46 = vmatpush.msra.mxu0 %v21_v10  ;;  %82 = vmatpush.msra.mxu1 %v21_v10 }
  0x18   :  { %47 = vmatpush.msra.mxu0 %v20_v11  ;;  %83 = vmatpush.msra.mxu1 %v20_v11 }
  0x1a   :  { %48 = vmatpush.msra.mxu0 %v19_v12  ;;  %84 = vmatpush.msra.mxu1 %v19_v12 }
  0x1c   :  { %49 = vmatpush.msra.mxu0 %v18_v13  ;;  %85 = vmatpush.msra.mxu1 %v18_v13 }
  0x1e   :  { %50 = vmatpush.msra.mxu0 %v17_v14  ;;  %86 = vmatpush.msra.mxu1 %v17_v14 }
  0x20   :  { %51 = vmatpush.msra.mxu0 %v16_v15  ;;  %87 = vmatpush.msra.mxu1 %v16_v15 }
  0x21   :  { %52 = vmatmul.f32.vlgmr.msra.gmra.mxu0 %v14_v16  ;;  %55 = vmatmul.f32.vlgmr.msra.gmra.mxu1 %v15_v17 }
  0x9e   :  { %v53_v19 = vpop.f32.mrf.mxu0  ;;  %v56_v20 = vpop.f32.mrf.mxu1 }
  0x9f   :  { %v54_v21 = vadd.f32 %v88_v18, %v53_v19  ;;  %v57_v22 = vadd.f32 %v88_v18, %v56_v20 }
  0xa1   :  { %vm59_vm1 = vcmp.ge.f32.partialorder %v54_v21, 0.0  ;;  %v61_v23 = vmul.f32 0.01, %v54_v21  ;;  %vm60_vm2 = vcmp.ge.f32.partialorder %v57_v22, 0.0  ;;  %v62_v24 = vmul.f32 0.01, %v57_v22 }
  0xa3   :  { %v63_v25 = vsel %vm59_vm1, %v54_v21, %v61_v23  ;;  %v64_v26 = vsel %vm60_vm2, %v57_v22, %v62_v24 }
  0xa4   :  { %66 = vst.msk [vmem:[%s175_s3] sm:$0xff] %vm65_vm0, %v63_v25 }
  0xa5   :  { %67 = vst.msk [vmem:[%s175_s3 + $0x8] sm:$0xff] %vm65_vm0, %v64_v26 }

// kernel: discriminator_forward.10
= control target key start
LH: loop header
LB: loop body
LE: loop exit
PB: predicated region body
PF: predicated region fallthrough
CT: control target
= control target key end

     0   :  { %vm59_vm0 = vcmask 15360   ;;  %s166_s1 = inlined_call_operand.vmem [shape: f32[128,2], index: 1, kind: input, shape index: {}]   ;;  %s167_s2 = inlined_call_operand.vmem [shape: f32[1,2], index: 2, kind: input, shape index: {}]   ;;  %s168_s0 = inlined_call_operand.vmem [shape: f32[16,128], index: 0, kind: input, shape index: {}]   ;;  %s169_s3 = inlined_call_operand.vmem [shape: f32[16,2], index: 3, kind: output, shape index: {}]  }
   0x1   :  { %v31_v0 = vld [vmem:[%s166_s1 + $0x78] sm:$0xff]  ;;  %v30_v1 = vld [vmem:[%s166_s1 + $0x70] sm:$0xff]  ;;  %v29_v2 = vld [vmem:[%s166_s1 + $0x68] sm:$0xff] }
   0x2   :  { %36 = vmatpush.msra.mxu0 %v31_v0  ;;  %66 = vmatpush.msra.mxu1 %v31_v0  ;;  %v28_v3 = vld [vmem:[%s166_s1 + $0x60] sm:$0xff]  ;;  %v27_v4 = vld [vmem:[%s166_s1 + $0x58] sm:$0xff]  ;;  %v26_v5 = vld [vmem:[%s166_s1 + $0x50] sm:$0xff] }
   0x3   :  { %v25_v6 = vld [vmem:[%s166_s1 + $0x48] sm:$0xff]  ;;  %v24_v7 = vld [vmem:[%s166_s1 + $0x40] sm:$0xff]  ;;  %v23_v8 = vld [vmem:[%s166_s1 + $0x38] sm:$0xff] }
   0x4   :  { %37 = vmatpush.msra.mxu0 %v30_v1  ;;  %67 = vmatpush.msra.mxu1 %v30_v1  ;;  %v22_v9 = vld [vmem:[%s166_s1 + $0x30] sm:$0xff]  ;;  %v21_v10 = vld [vmem:[%s166_s1 + $0x28] sm:$0xff]  ;;  %v20_v11 = vld [vmem:[%s166_s1 + $0x20] sm:$0xff] }
   0x5   :  { %v19_v12 = vld [vmem:[%s166_s1 + $0x18] sm:$0xff]  ;;  %v18_v13 = vld [vmem:[%s166_s1 + $0x10] sm:$0xff]  ;;  %v17_v14 = vld [vmem:[%s166_s1 + $0x8] sm:$0xff] }
   0x6   :  { %38 = vmatpush.msra.mxu0 %v29_v2  ;;  %68 = vmatpush.msra.mxu1 %v29_v2  ;;  %v16_v15 = vld [vmem:[%s166_s1] sm:$0xff]  ;;  %v15_v17 = vld [vmem:[%s168_s0 + $0x8] sm:$0xff] }
   0x7   :  { %v14_v16 = vld [vmem:[%s168_s0] sm:$0xff] }
   0x8   :  { %39 = vmatpush.msra.mxu0 %v28_v3  ;;  %69 = vmatpush.msra.mxu1 %v28_v3  ;;  %v82_v18 = vld [vmem:[%s167_s2] ss:$0 sm:$0xff] }
   0xa   :  { %40 = vmatpush.msra.mxu0 %v27_v4  ;;  %70 = vmatpush.msra.mxu1 %v27_v4 }
   0xc   :  { %41 = vmatpush.msra.mxu0 %v26_v5  ;;  %71 = vmatpush.msra.mxu1 %v26_v5 }
   0xe   :  { %42 = vmatpush.msra.mxu0 %v25_v6  ;;  %72 = vmatpush.msra.mxu1 %v25_v6 }
  0x10   :  { %43 = vmatpush.msra.mxu0 %v24_v7  ;;  %73 = vmatpush.msra.mxu1 %v24_v7 }
  0x12   :  { %44 = vmatpush.msra.mxu0 %v23_v8  ;;  %74 = vmatpush.msra.mxu1 %v23_v8 }
  0x14   :  { %45 = vmatpush.msra.mxu0 %v22_v9  ;;  %75 = vmatpush.msra.mxu1 %v22_v9 }
  0x16   :  { %46 = vmatpush.msra.mxu0 %v21_v10  ;;  %76 = vmatpush.msra.mxu1 %v21_v10 }
  0x18   :  { %47 = vmatpush.msra.mxu0 %v20_v11  ;;  %77 = vmatpush.msra.mxu1 %v20_v11 }
  0x1a   :  { %48 = vmatpush.msra.mxu0 %v19_v12  ;;  %78 = vmatpush.msra.mxu1 %v19_v12 }
  0x1c   :  { %49 = vmatpush.msra.mxu0 %v18_v13  ;;  %79 = vmatpush.msra.mxu1 %v18_v13 }
  0x1e   :  { %50 = vmatpush.msra.mxu0 %v17_v14  ;;  %80 = vmatpush.msra.mxu1 %v17_v14 }
  0x20   :  { %51 = vmatpush.msra.mxu0 %v16_v15  ;;  %81 = vmatpush.msra.mxu1 %v16_v15 }
  0x21   :  { %52 = vmatmul.f32.vlgmr.msra.gmra.mxu0 %v14_v16  ;;  %55 = vmatmul.f32.vlgmr.msra.gmra.mxu1 %v15_v17 }
  0x9e   :  { %v53_v19 = vpop.f32.mrf.mxu0  ;;  %v56_v20 = vpop.f32.mrf.mxu1 }
  0x9f   :  { %v54_v21 = vadd.f32 %v82_v18, %v53_v19  ;;  %v57_v22 = vadd.f32 %v82_v18, %v56_v20 }
  0xa1   :  { %60 = vst.msk [vmem:[%s169_s3] sm:$0xff] %vm59_vm0, %v54_v21 }
  0xa2   :  { %61 = vst.msk [vmem:[%s169_s3 + $0x8] sm:$0xff] %vm59_vm0, %v57_v22 }

// kernel: discriminator_forward.11
= control target key start
LH: loop header
LB: loop body
LE: loop exit
PB: predicated region body
PF: predicated region fallthrough
CT: control target
= control target key end

     0   :  { %vm100_vm0 = vcmask 121856   ;;  %s277_s1 = inlined_call_operand.vmem [shape: f32[256,15], index: 1, kind: input, shape index: {}]   ;;  %s278_s2 = inlined_call_operand.vmem [shape: f32[1,15], index: 2, kind: input, shape index: {}]   ;;  %s279_s0 = inlined_call_operand.vmem [shape: f32[16,256], index: 0, kind: input, shape index: {}]   ;;  %s280_s3 = inlined_call_operand.vmem [shape: f32[16,15], index: 3, kind: output, shape index: {}]  }
   0x1   :  { %v33_v0 = vld [vmem:[%s277_s1 + $0x78] sm:$0xff]  ;;  %v32_v1 = vld [vmem:[%s277_s1 + $0x70] sm:$0xff]  ;;  %v31_v4 = vld [vmem:[%s277_s1 + $0x68] sm:$0xff] }
   0x2   :  { %v49_v2 = vld [vmem:[%s277_s1 + $0xf8] sm:$0xff]  ;;  %107 = vmatpush.msra.mxu2 %v33_v0  ;;  %v48_v3 = vld [vmem:[%s277_s1 + $0xf0] sm:$0xff]  ;;  %54 = vmatpush.msra.mxu0 %v33_v0  ;;  %v47_v5 = vld [vmem:[%s277_s1 + $0xe8] sm:$0xff] }
   0x3   :  { %123 = vmatpush.msra.mxu3 %v49_v2  ;;  %77 = vmatpush.msra.mxu1 %v49_v2  ;;  %v30_v6 = vld [vmem:[%s277_s1 + $0x60] sm:$0xff]  ;;  %v29_v8 = vld [vmem:[%s277_s1 + $0x58] sm:$0xff]  ;;  %v28_v10 = vld [vmem:[%s277_s1 + $0x50] sm:$0xff] }
   0x4   :  { %108 = vmatpush.msra.mxu2 %v32_v1  ;;  %55 = vmatpush.msra.mxu0 %v32_v1  ;;  %v46_v7 = vld [vmem:[%s277_s1 + $0xe0] sm:$0xff]  ;;  %v45_v9 = vld [vmem:[%s277_s1 + $0xd8] sm:$0xff]  ;;  %v44_v11 = vld [vmem:[%s277_s1 + $0xd0] sm:$0xff] }
   0x5   :  { %124 = vmatpush.msra.mxu3 %v48_v3  ;;  %78 = vmatpush.msra.mxu1 %v48_v3  ;;  %v27_v12 = vld [vmem:[%s277_s1 + $0x48] sm:$0xff]  ;;  %v26_v14 = vld [vmem:[%s277_s1 + $0x40] sm:$0xff]  ;;  %v25_v16 = vld [vmem:[%s277_s1 + $0x38] sm:$0xff] }
   0x6   :  { %109 = vmatpush.msra.mxu2 %v31_v4  ;;  %56 = vmatpush.msra.mxu0 %v31_v4  ;;  %v43_v13 = vld [vmem:[%s277_s1 + $0xc8] sm:$0xff]  ;;  %v42_v15 = vld [vmem:[%s277_s1 + $0xc0] sm:$0xff]  ;;  %v41_v17 = vld [vmem:[%s277_s1 + $0xb8] sm:$0xff] }
   0x7   :  { %125 = vmatpush.msra.mxu3 %v47_v5  ;;  %79 = vmatpush.msra.mxu1 %v47_v5  ;;  %v24_v18 = vld [vmem:[%s277_s1 + $0x30] sm:$0xff]  ;;  %v23_v20 = vld [vmem:[%s277_s1 + $0x28] sm:$0xff]  ;;  %v22_v22 = vld [vmem:[%s277_s1 + $0x20] sm:$0xff] }
   0x8   :  { %110 = vmatpush.msra.mxu2 %v30_v6  ;;  %57 = vmatpush.msra.mxu0 %v30_v6  ;;  %v40_v19 = vld [vmem:[%s277_s1 + $0xb0] sm:$0xff]  ;;  %v39_v21 = vld [vmem:[%s277_s1 + $0xa8] sm:$0xff]  ;;  %v38_v23 = vld [vmem:[%s277_s1 + $0xa0] sm:$0xff] }
   0x9   :  { %126 = vmatpush.msra.mxu3 %v46_v7  ;;  %80 = vmatpush.msra.mxu1 %v46_v7  ;;  %v21_v24 = vld [vmem:[%s277_s1 + $0x18] sm:$0xff]  ;;  %v20_v26 = vld [vmem:[%s277_s1 + $0x10] sm:$0xff]  ;;  %v19_v28 = vld [vmem:[%s277_s1 + $0x8] sm:$0xff] }
   0xa   :  { %111 = vmatpush.msra.mxu2 %v29_v8  ;;  %58 = vmatpush.msra.mxu0 %v29_v8  ;;  %v37_v25 = vld [vmem:[%s277_s1 + $0x98] sm:$0xff]  ;;  %v36_v27 = vld [vmem:[%s277_s1 + $0x90] sm:$0xff]  ;;  %v35_v29 = vld [vmem:[%s277_s1 + $0x88] sm:$0xff] }
   0xb   :  { %127 = vmatpush.msra.mxu3 %v45_v9  ;;  %81 = vmatpush.msra.mxu1 %v45_v9  ;;  %v18_v30 = vld [vmem:[%s277_s1] sm:$0xff]  ;;  %v16_v32 = vld [vmem:[%s279_s0 + $0x10] sm:$0xff]  ;;  %v17_v33 = vld [vmem:[%s279_s0 + $0x18] sm:$0xff] }
   0xc   :  { %112 = vmatpush.msra.mxu2 %v28_v10  ;;  %59 = vmatpush.msra.mxu0 %v28_v10  ;;  %v34_v31 = vld [vmem:[%s277_s1 + $0x80] sm:$0xff]  ;;  %v15_v35 = vld [vmem:[%s279_s0 + $0x8] sm:$0xff] }
   0xd   :  { %128 = vmatpush.msra.mxu3 %v44_v11  ;;  %82 = vmatpush.msra.mxu1 %v44_v11  ;;  %v14_v34 = vld [vmem:[%s279_s0] sm:$0xff] }
   0xe   :  { %113 = vmatpush.msra.mxu2 %v27_v12  ;;  %60 = vmatpush.msra.mxu0 %v27_v12  ;;  %v139_v36 = vld [vmem:[%s278_s2] ss:$0 sm:$0xff] }
   0xf   :  { %129 = vmatpush.msra.mxu3 %v43_v13  ;;  %83 = vmatpush.msra.mxu1 %v43_v13 }
  0x10   :  { %114 = vmatpush.msra.mxu2 %v26_v14  ;;  %61 = vmatpush.msra.mxu0 %v26_v14 }
  0x11   :  { %130 = vmatpush.msra.mxu3 %v42_v15  ;;  %84 = vmatpush.msra.mxu1 %v42_v15 }
  0x12   :  { %115 = vmatpush.msra.mxu2 %v25_v16  ;;  %62 = vmatpush.msra.mxu0 %v25_v16 }
  0x13   :  { %131 = vmatpush.msra.mxu3 %v41_v17  ;;  %85 = vmatpush.msra.mxu1 %v41_v17 }
  0x14   :  { %116 = vmatpush.msra.mxu2 %v24_v18  ;;  %63 = vmatpush.msra.mxu0 %v24_v18 }
  0x15   :  { %132 = vmatpush.msra.mxu3 %v40_v19  ;;  %86 = vmatpush.msra.mxu1 %v40_v19 }
  0x16   :  { %117 = vmatpush.msra.mxu2 %v23_v20  ;;  %64 = vmatpush.msra.mxu0 %v23_v20 }
  0x17   :  { %133 = vmatpush.msra.mxu3 %v39_v21  ;;  %87 = vmatpush.msra.mxu1 %v39_v21 }
  0x18   :  { %118 = vmatpush.msra.mxu2 %v22_v22  ;;  %65 = vmatpush.msra.mxu0 %v22_v22 }
  0x19   :  { %134 = vmatpush.msra.mxu3 %v38_v23  ;;  %88 = vmatpush.msra.mxu1 %v38_v23 }
  0x1a   :  { %119 = vmatpush.msra.mxu2 %v21_v24  ;;  %66 = vmatpush.msra.mxu0 %v21_v24 }
  0x1b   :  { %135 = vmatpush.msra.mxu3 %v37_v25  ;;  %89 = vmatpush.msra.mxu1 %v37_v25 }
  0x1c   :  { %120 = vmatpush.msra.mxu2 %v20_v26  ;;  %67 = vmatpush.msra.mxu0 %v20_v26 }
  0x1d   :  { %136 = vmatpush.msra.mxu3 %v36_v27  ;;  %90 = vmatpush.msra.mxu1 %v36_v27 }
  0x1e   :  { %121 = vmatpush.msra.mxu2 %v19_v28  ;;  %68 = vmatpush.msra.mxu0 %v19_v28 }
  0x1f   :  { %137 = vmatpush.msra.mxu3 %v35_v29  ;;  %91 = vmatpush.msra.mxu1 %v35_v29 }
  0x20   :  { %122 = vmatpush.msra.mxu2 %v18_v30  ;;  %69 = vmatpush.msra.mxu0 %v18_v30 }
  0x21   :  { %138 = vmatpush.msra.mxu3 %v34_v31  ;;  %73 = vmatmul.f32.vlgmr.msra.gmra.mxu2 %v16_v32 }
  0x22   :  { %96 = vmatmul.f32.vlgmr.msra.gmra.mxu3 %v17_v33  ;;  %92 = vmatpush.msra.mxu1 %v34_v31 }
  0x23   :  { %70 = vmatmul.f32.vlgmr.msra.gmra.mxu0 %v14_v34  ;;  %93 = vmatmul.f32.vlgmr.msra.gmra.mxu1 %v15_v35 }
  0xa0   :  { %v71_v37 = vpop.f32.mrf.mxu0  ;;  %v94_v38 = vpop.f32.mrf.mxu1 }
  0xa1   :  { %v72_v39 = vadd.f32 %v139_v36, %v71_v37 }
  0xa3   :  { %v95_v40 = vadd.f32 %v94_v38, %v72_v39 }
  0xa4   :  { %v74_v41 = vpop.f32.mrf.mxu2 }
  0xa5   :  { %v97_v42 = vpop.f32.mrf.mxu3  ;;  %v75_v43 = vadd.f32 %v139_v36, %v74_v41  ;;  %101 = vst.msk [vmem:[%s280_s3] sm:$0xff] %vm100_vm0, %v95_v40 }
  0xa7   :  { %v98_v44 = vadd.f32 %v97_v42, %v75_v43 }
  0xa9   :  { %102 = vst.msk [vmem:[%s280_s3 + $0x8] sm:$0xff] %vm100_vm0, %v98_v44 }

</bundles_post_ra>
